<compile_context>
chip_gen: v7x
topology: tpu7x:2x2x1
jax: 0.10.0
libtpu: 0.0.40
codegen_flags: <defaults>
</compile_context>

<pallas_src>
import functools

import jax
import jax.numpy as jnp
from jax.experimental import pallas as pl
from jax.experimental.pallas import tpu as pltpu


# ---------------------------------------------------------------------------
# Fused Pallas kernel: head conv (im2col matmul) + bbox decode, one image/step.
# ---------------------------------------------------------------------------
def head_decode_kernel(col_ref, w_ref, b_ref, ctr_ref, obj_ref, box_ref, *,
                       stride):
    """col_ref: (1, 9*Cin, HW)  im2col slab, lane-dense HW on the 128-lane axis
       w_ref:   (Cout, 9*Cin)   conv weights, tap-major order [dy, dx, ci]
       b_ref:   (Cout, 1)       conv bias
       ctr_ref: (2, HW)         point centers (row 0 = x, row 1 = y), already * stride
       obj_ref: (1, 1, HW)      objectness logits
       box_ref: (1, 4, HW)      decoded boxes (x1, y1, x2, y2), channel-major
    """
    # 3x3 conv == one MXU matmul over the K = 9*Cin reduction (Cout = 1 + 4).
    head = jnp.dot(w_ref[...], col_ref[0],
                   preferred_element_type=jnp.float32) + b_ref[...]   # (Cout, HW)

    obj_ref[0] = head[0:1]                                            # objectness

    s = float(stride)
    cx = ctr_ref[0:1]                                                 # (1, HW)
    cy = ctr_ref[1:2]                                                 # (1, HW)
    # points2bbox: center + [-1, -1, +1, +1] * (l, t, r, b) * stride
    box_ref[0, 0:1] = cx - head[1:2] * s
    box_ref[0, 1:2] = cy - head[2:3] * s
    box_ref[0, 2:3] = cx + head[3:4] * s
    box_ref[0, 3:4] = cy + head[4:5] * s


# ---------------------------------------------------------------------------
# Per-level wrapper: im2col + centers prep, one fused pallas_call.
# ---------------------------------------------------------------------------
def rep_points_level(feat, w, b, stride):
    """feat: (N, Cin, H, W); w: (Cout, Cin, 3, 3) PyTorch Conv2d layout; b: (Cout,).

    Returns (boxes (N, H*W, 4), logits (N, H*W)) for one FPN level.
    """
    N, Cin, H, W = feat.shape
    Cout = w.shape[0]
    HW = H * W

    # im2col: 9 statically shifted, same-padded windows flattened lane-dense.
    xp = jnp.pad(feat.astype(jnp.float32), ((0, 0), (0, 0), (1, 1), (1, 1)))
    cols = [xp[:, :, dy:dy + H, dx:dx + W].reshape(N, Cin, HW)
            for dy in range(3) for dx in range(3)]
    col = jnp.concatenate(cols, axis=1)                            # (N, 9*Cin, HW)

    # (Cout, Cin, 3, 3) -> (Cout, 9*Cin) matching the [dy, dx, ci] tap order above.
    w2 = jnp.transpose(w, (0, 2, 3, 1)).reshape(Cout, 9 * Cin).astype(jnp.float32)
    b2 = b.reshape(Cout, 1).astype(jnp.float32)

    # get_center_grid: uniform_grid[i, j] = (x=j, y=i); centers = grid * stride.
    xs = jnp.arange(W, dtype=jnp.float32) * float(stride)
    ys = jnp.arange(H, dtype=jnp.float32) * float(stride)
    ctr = jnp.stack([jnp.tile(xs, H), jnp.repeat(ys, W)], axis=0)  # (2, HW)

    obj, box = pl.pallas_call(
        functools.partial(head_decode_kernel, stride=float(stride)),
        out_shape=(jax.ShapeDtypeStruct((N, 1, HW), jnp.float32),
                   jax.ShapeDtypeStruct((N, 4, HW), jnp.float32)),
        grid=(N,),
        in_specs=[
            pl.BlockSpec((1, 9 * Cin, HW), lambda n: (n, 0, 0)),
            pl.BlockSpec((Cout, 9 * Cin), lambda n: (0, 0)),
            pl.BlockSpec((Cout, 1), lambda n: (0, 0)),
            pl.BlockSpec((2, HW), lambda n: (0, 0)),
        ],
        out_specs=(
            pl.BlockSpec((1, 1, HW), lambda n: (n, 0, 0)),
            pl.BlockSpec((1, 4, HW), lambda n: (n, 0, 0)),
        ),
        compiler_params=pltpu.CompilerParams(
            dimension_semantics=("parallel",)),
    )(col, w2, b2, ctr)

    logits = obj.reshape(N, HW)                 # predict_objectness_logits level i
    boxes = jnp.transpose(box, (0, 2, 1))       # predict_proposals level i: (N, HW, 4)
    return boxes, logits


# ---------------------------------------------------------------------------
# RepPointsGenerator forward (eval mode)
# ---------------------------------------------------------------------------
def rep_points_generator_forward(features_nchw, level_strides, w, b):
    """Mirrors RepPointsGenerator.forward in inference mode.

    Returns:
      proposals: list per level of (N, Hi*Wi, 4)   == predict_proposals()
      logits:    list per level of (N, Hi*Wi)      == predict_objectness_logits()
    """
    proposals, logits = [], []
    for feat, stride in zip(features_nchw, level_strides):
        boxes_i, logits_i = rep_points_level(feat, w, b, stride)
        proposals.append(boxes_i)
        logits.append(logits_i)
    # Eval mode: gt_labels / gt_boxes / losses are not computed (losses = {}).
    # TODO(synk): find_top_rpn_proposals (per-image top-k + NMS) has no clean
    # Pallas equivalent; raw per-level proposals/logits are returned instead.
    return proposals, logits


# ---------------------------------------------------------------------------
# Pure-JAX reference (for correctness check only)
# ---------------------------------------------------------------------------
def reference_level(feat, w, b, stride):
    N, Cin, H, W = feat.shape
    Cout = w.shape[0]
    HW = H * W
    xp = jnp.pad(feat.astype(jnp.float32), ((0, 0), (0, 0), (1, 1), (1, 1)))
    out = jnp.zeros((N, Cout, H, W), jnp.float32) + b[None, :, None, None]
    for dy in range(3):
        for dx in range(3):
            win = xp[:, :, dy:dy + H, dx:dx + W]                     # (N, Cin, H, W)
            out = out + jnp.einsum("nchw,oc->nohw", win, w[:, :, dy, dx])
    obj = out[:, 0].reshape(N, HW)
    deltas = out[:, 1:5].reshape(N, 4, HW)
    xs = jnp.arange(W, dtype=jnp.float32) * float(stride)
    ys = jnp.arange(H, dtype=jnp.float32) * float(stride)
    cx = jnp.tile(xs, H)[None]
    cy = jnp.repeat(ys, W)[None]
    s = float(stride)
    boxes = jnp.stack([cx - deltas[:, 0] * s, cy - deltas[:, 1] * s,
                       cx + deltas[:, 2] * s, cy + deltas[:, 3] * s], axis=-1)
    return boxes, obj


# ---------------------------------------------------------------------------
if __name__ == "__main__":
    key = jax.random.PRNGKey(0)
    kf1, kf2, kw, kb = jax.random.split(key, 4)

    N, Cin = 2, 4
    level_strides = [8, 16]
    features = [
        jax.random.normal(kf1, (N, Cin, 16, 16), jnp.float32),  # level "p3"
        jax.random.normal(kf2, (N, Cin, 8, 8), jnp.float32),    # level "p4"
    ]

    Cout = 1 + 4  # 1 objectness channel + 4 bbox-delta channels
    # PyTorch Conv2d weight layout: (Cout, Cin, kH, kW)
    w = 0.1 * jax.random.normal(kw, (Cout, Cin, 3, 3), jnp.float32)
    b = 0.1 * jax.random.normal(kb, (Cout,), jnp.float32)

    proposals, logits = rep_points_generator_forward(features, level_strides, w, b)
    for p, l in zip(proposals, logits):
        jax.block_until_ready(p)
        jax.block_until_ready(l)

    assert proposals[0].shape == (N, 16 * 16, 4) and logits[0].shape == (N, 16 * 16)
    assert proposals[1].shape == (N, 8 * 8, 4) and logits[1].shape == (N, 8 * 8)

    # Numerical check against a pure-JAX reference (tolerances allow for MXU
    # precision-mode differences between Pallas and XLA matmuls).
    for feat, stride, p, l in zip(features, level_strides, proposals, logits):
        ref_boxes, ref_logits = reference_level(feat, w, b, stride)
        assert jnp.allclose(l, ref_logits, atol=5e-2, rtol=1e-2), "logits mismatch"
        assert jnp.allclose(p, ref_boxes, atol=5e-1, rtol=1e-2), "boxes mismatch"

    print("KERNEL_OK")
</pallas_src>

<mosaic_0001>
module attributes {stable_mosaic.version = 11 : i64} {
  func.func @head_decode_kernel(%arg0: i32, %arg1: memref<1x36x256xf32, #tpu.memory_space<vmem>>, %arg2: memref<5x36xf32, #tpu.memory_space<vmem>>, %arg3: memref<5x1xf32, #tpu.memory_space<vmem>>, %arg4: memref<2x256xf32, #tpu.memory_space<vmem>>, %arg5: memref<1x1x256xf32, #tpu.memory_space<vmem>>, %arg6: memref<1x4x256xf32, #tpu.memory_space<vmem>>) attributes {dimension_semantics = [#tpu.dimension_semantics<parallel>], iteration_bounds = array<i64: 2>, scalar_prefetch = 0 : i64, scratch_operands = 0 : i64, tpu.core_type = #tpu.core_type<tc>, window_params = [{transform_indices = @transform_0, window_bounds = array<i64: 1, 36, 256>}, {pipeline_mode = #tpu.pipeline_mode<synchronous>, transform_indices = @transform_1, window_bounds = array<i64: 5, 36>}, {pipeline_mode = #tpu.pipeline_mode<synchronous>, transform_indices = @transform_2, window_bounds = array<i64: 5, 1>}, {pipeline_mode = #tpu.pipeline_mode<synchronous>, transform_indices = @transform_3, window_bounds = array<i64: 2, 256>}, {transform_indices = @transform_4, window_bounds = array<i64: 1, 1, 256>}, {transform_indices = @transform_5, window_bounds = array<i64: 1, 4, 256>}]} {
    %c0 = arith.constant 0 : index
    %c0_0 = arith.constant 0 : index
    %0 = vector.load %arg2[%c0, %c0_0] : memref<5x36xf32, #tpu.memory_space<vmem>>, vector<5x36xf32>
    %c0_1 = arith.constant 0 : index
    %c0_2 = arith.constant 0 : index
    %c0_3 = arith.constant 0 : index
    %1 = vector.load %arg1[%c0_1, %c0_2, %c0_3] : memref<1x36x256xf32, #tpu.memory_space<vmem>>, vector<1x36x256xf32>
    %2 = vector.shape_cast %1 : vector<1x36x256xf32> to vector<36x256xf32>
    %cst = arith.constant dense<0.000000e+00> : vector<5x256xf32>
    %3 = tpu.matmul %0, %2, %cst {dimension_numbers = #tpu.dot_dimension_numbers<[1], [0], [0], [1], [0, 0, 1, 1], [], []>} : vector<5x36xf32>, vector<36x256xf32>, vector<5x256xf32> -> vector<5x256xf32>
    %c0_4 = arith.constant 0 : index
    %c0_5 = arith.constant 0 : index
    %4 = vector.load %arg3[%c0_4, %c0_5] : memref<5x1xf32, #tpu.memory_space<vmem>>, vector<5x1xf32>
    %5 = vector.broadcast %4 : vector<5x1xf32> to vector<5x256xf32>
    %6 = arith.addf %3, %5 : vector<5x256xf32>
    %7 = vector.extract_strided_slice %6 {offsets = [0, 0], sizes = [1, 256], strides = [1, 1]} : vector<5x256xf32> to vector<1x256xf32>
    %c0_6 = arith.constant 0 : index
    %c0_7 = arith.constant 0 : index
    %c0_8 = arith.constant 0 : index
    %8 = vector.load %arg5[%c0_6, %c0_7, %c0_8] : memref<1x1x256xf32, #tpu.memory_space<vmem>>, vector<1x1x256xf32>
    %9 = vector.shape_cast %8 : vector<1x1x256xf32> to vector<1x256xf32>
    %10 = vector.shape_cast %7 : vector<1x256xf32> to vector<1x1x256xf32>
    tpu.vector_store %arg5[%c0_6, %c0_7, %c0_8], %10 {strides = array<i32>} : memref<1x1x256xf32, #tpu.memory_space<vmem>>, vector<1x1x256xf32>,
    %c0_9 = arith.constant 0 : index
    %c0_10 = arith.constant 0 : index
    %11 = vector.load %arg4[%c0_9, %c0_10] : memref<2x256xf32, #tpu.memory_space<vmem>>, vector<1x256xf32>
    %c1 = arith.constant 1 : index
    %c0_11 = arith.constant 0 : index
    %12 = vector.load %arg4[%c1, %c0_11] : memref<2x256xf32, #tpu.memory_space<vmem>>, vector<1x256xf32>
    %13 = vector.extract_strided_slice %6 {offsets = [1, 0], sizes = [1, 256], strides = [1, 1]} : vector<5x256xf32> to vector<1x256xf32>
    %cst_12 = arith.constant 8.000000e+00 : f32
    %14 = vector.broadcast %cst_12 : f32 to vector<1x256xf32>
    %15 = arith.mulf %13, %14 : vector<1x256xf32>
    %16 = arith.subf %11, %15 : vector<1x256xf32>
    %c0_13 = arith.constant 0 : index
    %c0_14 = arith.constant 0 : index
    %c0_15 = arith.constant 0 : index
    %17 = vector.load %arg6[%c0_13, %c0_14, %c0_15] : memref<1x4x256xf32, #tpu.memory_space<vmem>>, vector<1x1x256xf32>
    %18 = vector.shape_cast %17 : vector<1x1x256xf32> to vector<1x256xf32>
    %19 = vector.shape_cast %16 : vector<1x256xf32> to vector<1x1x256xf32>
    tpu.vector_store %arg6[%c0_13, %c0_14, %c0_15], %19 {strides = array<i32>} : memref<1x4x256xf32, #tpu.memory_space<vmem>>, vector<1x1x256xf32>,
    %20 = vector.extract_strided_slice %6 {offsets = [2, 0], sizes = [1, 256], strides = [1, 1]} : vector<5x256xf32> to vector<1x256xf32>
    %cst_16 = arith.constant 8.000000e+00 : f32
    %21 = vector.broadcast %cst_16 : f32 to vector<1x256xf32>
    %22 = arith.mulf %20, %21 : vector<1x256xf32>
    %23 = arith.subf %12, %22 : vector<1x256xf32>
    %c0_17 = arith.constant 0 : index
    %c1_18 = arith.constant 1 : index
    %c0_19 = arith.constant 0 : index
    %24 = vector.load %arg6[%c0_17, %c1_18, %c0_19] : memref<1x4x256xf32, #tpu.memory_space<vmem>>, vector<1x1x256xf32>
    %25 = vector.shape_cast %24 : vector<1x1x256xf32> to vector<1x256xf32>
    %26 = vector.shape_cast %23 : vector<1x256xf32> to vector<1x1x256xf32>
    tpu.vector_store %arg6[%c0_17, %c1_18, %c0_19], %26 {strides = array<i32>} : memref<1x4x256xf32, #tpu.memory_space<vmem>>, vector<1x1x256xf32>,
    %27 = vector.extract_strided_slice %6 {offsets = [3, 0], sizes = [1, 256], strides = [1, 1]} : vector<5x256xf32> to vector<1x256xf32>
    %cst_20 = arith.constant 8.000000e+00 : f32
    %28 = vector.broadcast %cst_20 : f32 to vector<1x256xf32>
    %29 = arith.mulf %27, %28 : vector<1x256xf32>
    %30 = arith.addf %11, %29 : vector<1x256xf32>
    %c0_21 = arith.constant 0 : index
    %c2 = arith.constant 2 : index
    %c0_22 = arith.constant 0 : index
    %31 = vector.load %arg6[%c0_21, %c2, %c0_22] : memref<1x4x256xf32, #tpu.memory_space<vmem>>, vector<1x1x256xf32>
    %32 = vector.shape_cast %31 : vector<1x1x256xf32> to vector<1x256xf32>
    %33 = vector.shape_cast %30 : vector<1x256xf32> to vector<1x1x256xf32>
    tpu.vector_store %arg6[%c0_21, %c2, %c0_22], %33 {strides = array<i32>} : memref<1x4x256xf32, #tpu.memory_space<vmem>>, vector<1x1x256xf32>,
    %34 = vector.extract_strided_slice %6 {offsets = [4, 0], sizes = [1, 256], strides = [1, 1]} : vector<5x256xf32> to vector<1x256xf32>
    %cst_23 = arith.constant 8.000000e+00 : f32
    %35 = vector.broadcast %cst_23 : f32 to vector<1x256xf32>
    %36 = arith.mulf %34, %35 : vector<1x256xf32>
    %37 = arith.addf %12, %36 : vector<1x256xf32>
    %c0_24 = arith.constant 0 : index
    %c3 = arith.constant 3 : index
    %c0_25 = arith.constant 0 : index
    %38 = vector.load %arg6[%c0_24, %c3, %c0_25] : memref<1x4x256xf32, #tpu.memory_space<vmem>>, vector<1x1x256xf32>
    %39 = vector.shape_cast %38 : vector<1x1x256xf32> to vector<1x256xf32>
    %40 = vector.shape_cast %37 : vector<1x256xf32> to vector<1x1x256xf32>
    tpu.vector_store %arg6[%c0_24, %c3, %c0_25], %40 {strides = array<i32>} : memref<1x4x256xf32, #tpu.memory_space<vmem>>, vector<1x1x256xf32>,
    return
  }
  func.func @transform_0(%arg0: i32) -> (i32, i32, i32) {
    %c0_i32 = arith.constant 0 : i32
    %c0_i32_0 = arith.constant 0 : i32
    %c0_i32_1 = arith.constant 0 : i32
    return %arg0, %c0_i32, %c0_i32_0 : i32, i32, i32
  }
  func.func @transform_1(%arg0: i32) -> (i32, i32) {
    %c0_i32 = arith.constant 0 : i32
    %c0_i32_0 = arith.constant 0 : i32
    %c0_i32_1 = arith.constant 0 : i32
    return %c0_i32, %c0_i32_0 : i32, i32
  }
  func.func @transform_2(%arg0: i32) -> (i32, i32) {
    %c0_i32 = arith.constant 0 : i32
    %c0_i32_0 = arith.constant 0 : i32
    %c0_i32_1 = arith.constant 0 : i32
    return %c0_i32, %c0_i32_0 : i32, i32
  }
  func.func @transform_3(%arg0: i32) -> (i32, i32) {
    %c0_i32 = arith.constant 0 : i32
    %c0_i32_0 = arith.constant 0 : i32
    %c0_i32_1 = arith.constant 0 : i32
    return %c0_i32, %c0_i32_0 : i32, i32
  }
  func.func @transform_4(%arg0: i32) -> (i32, i32, i32) {
    %c0_i32 = arith.constant 0 : i32
    %c0_i32_0 = arith.constant 0 : i32
    %c0_i32_1 = arith.constant 0 : i32
    return %arg0, %c0_i32, %c0_i32_0 : i32, i32, i32
  }
  func.func @transform_5(%arg0: i32) -> (i32, i32, i32) {
    %c0_i32 = arith.constant 0 : i32
    %c0_i32_0 = arith.constant 0 : i32
    %c0_i32_1 = arith.constant 0 : i32
    return %arg0, %c0_i32, %c0_i32_0 : i32, i32, i32
  }
}

</mosaic_0001>

<bundles_post_ra>
// kernel: tpu_custom_call.1
= control target key start
LH: loop header
LB: loop body
LE: loop exit
PB: predicated region body
PF: predicated region fallthrough
CT: control target
= control target key end

     0   :  { %11 = vsyncpa [#allocation3], 0  ;;  %s918_s0 = inlined_call_operand.vmem [shape: f32[2,36,256], index: 0, kind: input, shape index: {}]   ;;  %s919_s1 = inlined_call_operand.vmem [shape: f32[5,36], index: 1, kind: input, shape index: {}]   ;;  %s920_s2 = inlined_call_operand.vmem [shape: f32[5,1], index: 2, kind: input, shape index: {}]   ;;  %s921_s3 = inlined_call_operand.vmem [shape: f32[2,256], index: 3, kind: input, shape index: {}]   ;;  %s922_s4 = inlined_call_operand.hbm [shape: f32[2,1,256], index: 4, kind: output, shape index: {0}]   ;;  %s923_s5 = inlined_call_operand.hbm [shape: f32[2,4,256], index: 5, kind: output, shape index: {1}]  }
   0x1   :  { %13 = vsyncpa [#allocation3 + $0x1], 0 }
   0x2   :  { %14 = vsyncpa [#allocation5], 0 }
   0x3   :  { %16 = vsyncpa [#allocation5 + $0x1], 0  ;;  %s755_s18 = smov 0   ;;  %s757_s19 = smov 0  }
   0x4   :  { %s759_s20 = smov 0   ;;  %s761_s21 = smov 0  }
   0x5 LB: > { %s776_s22 = sadd.s32 4294967295, %s718_s21   ;;  %s543_s23 = sadd.s32 4294967294, %s718_s21   ;;  %s718_s21 = sphi %s761_s21, %s931_s21   ;;  %s714_s20 = sphi %s759_s20, %s930_s20   ;;  %s710_s19 = sphi %s757_s19, %s929_s19   ;;  %s706_s18 = sphi %s755_s18, %s928_s18  }
   0x6   : > { %s780_s24 = sadd.s32 1, %s718_s21   ;;  %s118_s25 = sadd.s32 1, %s714_s20 }
   0x7   : > { %s115_s26 = ssub.s32 %s718_s21, %s780_s24  ;;  %p128_p0 = scmp.ne.s32.totalorder %s714_s20, %s710_s19 }
   0x8   : > { %p116_p1 = scmp.eq.s32.totalorder %s115_s26, 0  ;;  %p129_p2 = scmp.eq.s32.totalorder %s776_s22, 1 }
   0x9   : > { %p134_p3 = scmp.ne.s32.totalorder %s710_s19, %s706_s18  ;;  %p135_p4 = scmp.eq.s32.totalorder %s543_s23, 1 }
   0xa   : > { %s791_s27 = scalar_select %p116_p1, %s714_s20, %s118_s25  }
   0xb   : > { %p793_p5 = por %p129_p2, %p128_p0  ;;  %p797_p6 = por %p135_p4, %p134_p3 }
   0xc   : > { %p546_p7 = scmp.ge.s32.totalorder %s718_s21, 1  ;;  %p196_p8 = scmp.lt.s32.totalorder %s718_s21, 3 }
   0xe   : > { %p197_p9 = pnand %p546_p7, %p196_p8 }
   0xf   : > { %p229_p10 = scmp.lt.s32.totalorder (!%p197_p9), %s776_s22, 1  ;;  %v720_v0 = vmov (!%p197_p9), 0.0   ;;  %v245_v1 = vld [vmem:[%s920_s2] sm:$0x1f] (!%p197_p9)  ;;  %v721_v2 = vmov (!%p197_p9), 0   ;;  %vm255_vm0 = vcmask (!%p197_p9), 1043456   ;;  %v339_v20 = vlaneseq (!%p197_p9) }
  0x10   : > { %200 = sbr.rel (%p197_p9) target bundleno = 302 (0x12e), region = 36  ;;  %326 = vmatprep.mubr.f32.mxu0 (!%p197_p9), %v720_v0  ;;  %623 = vset.pattern.permute.xlu0 (!%p197_p9), %v721_v2  ;;  %v234_v17 = vld [vmem:[%s919_s1] sm:$0x1f] (!%p197_p9)  ;;  %vm251_vm1 = vcmask (!%p197_p9), 293888   ;;  %v722_v18 = vmov (!%p197_p9), 1966171168  }
  0x11   : > { %248 = vperm.xlu0 (!%p197_p9), %623, %v245_v1   ;;  %v337_v19 = vunpack.c.l.s4 (!%p197_p9), %v722_v18  ;;  %v340_v23 = vshrl.u32 (!%p197_p9), %v339_v20, 7  ;;  %s815_s14 = sand.u32 (!%p197_p9), 1, %s710_s19   ;;  %s565_s16 = sshll.u32 (!%p197_p9), %s776_s22, 5  ;;  %vm820_vm2 = vcmp.lt.s32.totalorder (!%p197_p9), %v339_v20, 256 }
  0x12   : > { %s547_s15 = sshll.u32 (!%p197_p9), %s815_s14, 1  ;;  %s548_s25 = sshll.u32 (!%p197_p9), %s815_s14, 3  ;;  %v553_v39 = vld [vmem:[%s921_s3 + $0x1] ss:$2 sm:$0x3] (!%p197_p9) }
  0x13   : > { %v338_v22 = vunpack.c.0.s8 (!%p197_p9), %v337_v19  ;;  %s221_s17 = scalar_lea.vmem (!%p197_p9), [#allocation2], %s547_s15  ;;  %s827_s6 = scalar_lea.hbm (!%p197_p9), %s922_s4, %s565_s16  ;;  %v356_v43 = vld [vmem:[%s921_s3] ss:$2 sm:$0x3] (!%p197_p9) }
  0x14   : > { %s438_s23 = sshll.u32 (!%p197_p9), %s221_s17, 4  ;;  %s723_s13 = smov (!%p197_p9), [#allocation2]   ;;  %s829_s23 = int_to_ptr.vmem [resolvable:$true] %s438_s23 }
  0x15   : > { %v341_v28 = vsub.s32 (!%p197_p9), %v338_v22, %v340_v23  ;;  %s624_s12 = scalar_lea.vmem (!%p197_p9), %s829_s23, 32  ;;  %s628_s15 = sshll.u32 (!%p197_p9), %s723_s13, 4  ;;  %s629_s15 = int_to_ptr.vmem [resolvable:$false] %s628_s15 }
  0x16   : > { %p625_p11 = scmp.ne.s32.totalorder (!%p197_p9), %s829_s23, %s624_s12  ;;  %s630_s16 = scalar_lea.vmem (!%p197_p9), %s629_s15, 64 }
  0x17   : > { %s230_s7 = scalar_select %p229_p10, %s776_s22, 1 }
  0x18   : > { %p626_p12 = pnand %p625_p11, %p793_p5  ;;  %p631_p0 = scmp.lt.s32.totalorder %s829_s23, %s629_s15 }
  0x19   : > { %s575_s8 = smul.u32 80, %s230_s7  ;;  %p632_p1 = scmp.lt.s32.totalorder %s630_s16, %s624_s12 }
  0x1a   : > { %p627_p13 = pneg %p626_p12 }
  0x1b   : > { %s233_s11 = scalar_lea.vmem %s918_s0, %s575_s8  ;;  %p633_p2 = por %p632_p1, %p631_p0 }
  0x1c   : > { %v236_v3 = vld [vmem:[%s233_s11 + $0x8] sm:$0xff]  ;;  %v238_v4 = vld [vmem:[%s233_s11 + $0x18] sm:$0xff]  ;;  %v235_v5 = vld [vmem:[%s233_s11] sm:$0xff] }
  0x1d   : > { %v567_v6 = vpack.c.bf16 %v238_v4, %v236_v3  ;;  %v237_v7 = vld [vmem:[%s233_s11 + $0x10] sm:$0xff]  ;;  %v240_v8 = vld [vmem:[%s233_s11 + $0x28] sm:$0xff]  ;;  %v242_v9 = vld [vmem:[%s233_s11 + $0x38] sm:$0xff]  ;;  %p634_p3 = pnand %p633_p2, %p627_p13 }
  0x1e   : > { %v569_v10 = vpack.c.bf16 %v237_v7, %v235_v5  ;;  %v571_v11 = vpack.c.bf16 %v242_v9, %v240_v8  ;;  %v239_v12 = vld [vmem:[%s233_s11 + $0x20] sm:$0xff]  ;;  %v241_v13 = vld [vmem:[%s233_s11 + $0x30] sm:$0xff]  ;;  %v244_v15 = vld [vmem:[%s233_s11 + $0x48] sm:$0xf] }
  0x1f   : > { %568 = vmatprep.subr.bf16.mxu0 %v567_v6  ;;  %v573_v14 = vpack.c.bf16 %v241_v13, %v239_v12  ;;  %v243_v16 = vld [vmem:[%s233_s11 + $0x40] sm:$0xf]  ;;  %s419_s11 = scalar_lea.sflag [#allocation3], %s815_s14 }
  0x20   : > { %570 = vmatpush1.bf16.msra.mxu0 %v569_v10 }
  0x21   : > { %572 = vmatprep.subr.bf16.mxu0 %v571_v11 }
  0x24   : > { %574 = vmatpush1.bf16.msra.mxu0 %v573_v14 }
  0x25   : > { %550 = vmatprep.subr.msk.mxu0 %vm255_vm0, %v244_v15 }
  0x28   : > { %551 = vmatpush1.msk.msra.mxu0 %vm255_vm0, %v243_v16 }
  0x29   : > { %552 = vmatmul.mubr.msk.f32.vlgmr.msra.gmra.mrb[0].mxu0 %vm251_vm1, %v234_v17 }
  0x90   : > { %v249_v21 = vpop.permute.xlu0 %248 }
  0xfc   : > { %v328_v24 = vpop.f32.mrb[0].mxu0 }
  0xfd   : > { %v329_v25 = vadd.f32 %v328_v24, %v249_v21  ;;  %v330_v26 = vpop.f32.mrb[1].mxu0 }
  0xfe   : > { %v331_v27 = vadd.f32 %v330_v26, %v249_v21 }
  0xff   : > { %v359_v29 = vmul.f32 8.0, %v329_v25 }
 0x100   : > { %v335_v30 = vcombine.low %v329_v25, %v331_v27  ;;  %v360_v31 = vmul.f32 8.0, %v331_v27 }
 0x102   : > { %v342_v32 = vrot.slane %v335_v30, %v341_v28  ;;  %v363_v33 = vcombine.low %v359_v29, %v360_v31  ;;  %v399_v34 = vcombine.high %v359_v29, %v360_v31 }
 0x104   : > { %v349_v36 = vrot.slane %v342_v32, %v341_v28  ;;  %v370_v37 = vrot.slane %v363_v33, %v341_v28  ;;  %v406_v38 = vrot.slane %v399_v34, %v341_v28 }
 0x106   : > { %v371_v40 = vcombine.high %v370_v37, %v370_v37  ;;  %v388_v41 = vrot.slane %v370_v37, %v341_v28  ;;  %v413_v42 = vrot.slane %v406_v38, %v341_v28  ;;  %355 = vst.msk [vmem:[%s221_s17] sm:$0x3] %vm820_vm2, %v349_v36 }
 0x107   : > { %637 = shalt.err (!%p634_p3)
}
 0x108   : > { %s638_s17 = scalar_lea.hbm %s827_s6, 32  ;;  %s642_s7 = scalar_lea.hbm %s922_s4, 64 }
 0x109   : > { %p639_p4 = scmp.ne.s32.totalorder %s827_s6, %s638_s17  ;;  %p643_p9 = scmp.lt.u32.totalorder %s827_s6, %s922_s4 }
 0x10a   : > { %p644_p10 = scmp.lt.u32.totalorder %s642_s7, %s638_s17  ;;  %p646_p12 = scmp.lt.u32.totalorder %s638_s17, %s827_s6 }
 0x10b   : > { %p640_p7 = pnand %p639_p4, %p793_p5 }
 0x10c   : > { %p645_p11 = por %p644_p10, %p643_p9 }
 0x10d   : > { %p641_p8 = pneg %p640_p7 }
 0x10e   : > { %p647_p13 = por %p646_p12, %p645_p11 }
 0x110   : > { %p648_p0 = pnand %p647_p13, %p641_p8 }
 0x112   : > { %651 = shalt.err (!%p648_p0)
}
 0x113   : > { %576 = dma.vmem_to_hbm [thread:$0]  (%p793_p5), %s829_s23, 32, %s827_s6, %s419_s11   ;;  %v378_v44 = vrot.slane %v371_v40, %v341_v28  ;;  %v389_v45 = vcombine.high %v388_v41, %v388_v41  ;;  %v415_v46 = vadd.f32 %v553_v39, %v413_v42 }
 0x114   : > { %s566_s10 = sshll.u32 %s776_s22, 7  ;;  %s228_s12 = scalar_lea.vmem [#allocation4], %s548_s25 }
 0x115   : > { %s452_s13 = sshll.u32 %s228_s12, 4  ;;  %v380_v47 = vsub.f32 %v356_v43, %v378_v44  ;;  %v391_v48 = vsub.f32 %v553_v39, %v389_v45  ;;  %v394_v49 = vcombine.high %v378_v44, %v378_v44  ;;  %556 = vst.msk [vmem:[%s228_s12 + $0x3] ss:$4 sm:$0x3] %vm820_vm2, %v415_v46  ;;  %s873_s22 = scalar_lea.hbm %s923_s5, %s566_s10  ;;  %s875_s13 = int_to_ptr.vmem [resolvable:$true] %s452_s13 }
 0x116   : > { %s424_s25 = scalar_lea.sflag [#allocation5], %s815_s14  ;;  %s652_s11 = scalar_lea.vmem %s875_s13, 128 }
 0x117   : > { %v396_v50 = vadd.f32 %v394_v49, %v356_v43  ;;  %381 = vst.msk [vmem:[%s228_s12] ss:$4 sm:$0x3] %vm820_vm2, %v380_v47  ;;  %554 = vst.msk [vmem:[%s228_s12 + $0x1] ss:$4 sm:$0x3] %vm820_vm2, %v391_v48  ;;  %p653_p1 = scmp.ne.s32.totalorder %s875_s13, %s652_s11 }
 0x118   : > { %s724_s15 = smov [#allocation4]  }
 0x119   : > { %555 = vst.msk [vmem:[%s228_s12 + $0x2] ss:$4 sm:$0x3] %vm820_vm2, %v396_v50  ;;  %p654_p2 = pnand %p653_p1, %p793_p5  ;;  %s656_s16 = sshll.u32 %s724_s15, 4  ;;  %s657_s16 = int_to_ptr.vmem [resolvable:$false] %s656_s16 }
 0x11a   : > { %s658_s17 = scalar_lea.vmem %s657_s16, 256  ;;  %p659_p4 = scmp.lt.s32.totalorder %s875_s13, %s657_s16 }
 0x11b   : > { %p655_p3 = pneg %p654_p2  ;;  %p660_p7 = scmp.lt.s32.totalorder %s658_s17, %s652_s11 }
 0x11d   : > { %p661_p8 = por %p660_p7, %p659_p4 }
 0x11f   : > { %p662_p9 = pnand %p661_p8, %p655_p3 }
 0x121   : > { %665 = shalt.err (!%p662_p9)
}
 0x122   : > { %s666_s14 = scalar_lea.hbm %s873_s22, 128  ;;  %s670_s7 = scalar_lea.hbm %s923_s5, 256 }
 0x123   : > { %p667_p10 = scmp.ne.s32.totalorder %s873_s22, %s666_s14  ;;  %p671_p13 = scmp.lt.u32.totalorder %s873_s22, %s923_s5 }
 0x124   : > { %p672_p0 = scmp.lt.u32.totalorder %s670_s7, %s666_s14  ;;  %p674_p2 = scmp.lt.u32.totalorder %s666_s14, %s873_s22 }
 0x125   : > { %p668_p11 = pnand %p667_p10, %p793_p5 }
 0x126   : > { %p673_p1 = por %p672_p0, %p671_p13 }
 0x127   : > { %p669_p12 = pneg %p668_p11 }
 0x128   : > { %p675_p3 = por %p674_p2, %p673_p1 }
 0x12a   : > { %p676_p4 = pnand %p675_p3, %p669_p12 }
 0x12c   : > { %679 = shalt.err (!%p676_p4)
}
 0x12d   : > { %577 = dma.vmem_to_hbm [thread:$0]  (%p793_p5), %s875_s13, 128, %s873_s22, %s424_s25  }
 0x12e PF: > { %p587_p7 = scmp.ge.s32.totalorder %s718_s21, 2  ;;  %s464_s10 = sand.u32 1, %s706_s18  }
 0x12f   : > { %s465_s12 = scalar_lea.sflag [#allocation3], %s464_s10 }
 0x130   : > { %p581_p8 = pnand %p587_p7, %p797_p6 }
 0x132   : > { %697 = dma.done.wait (!%p581_p8), %s465_s12, 32  }
 0x133   : > { %699 = vsyncadd (!%p581_p8), %s465_s12, 4294967264  ;;  %s474_s23 = scalar_lea.sflag [#allocation5], %s464_s10 }
 0x134   : > { %701 = dma.done.wait (!%p581_p8), %s474_s23, 128  }
 0x135   : > { %703 = vsyncadd (!%p581_p8), %s474_s23, 4294967168  ;;  %p19_p5 = scmp.ge.s32.totalorder %s780_s24, 4   ;;  %s928_s18 = smov %s710_s19 }
 0x136   : > { %s929_s19 = smov %s714_s20  ;;  %s930_s20 = smov %s791_s27 }
 0x137   : > { %s931_s21 = smov %s780_s24  ;;  %21 = sbr.rel (!%p19_p5) target bundleno = 5 (0x5), region = 92 }
 0x13e   :  { %479 = vsyncpa [#allocation3], 1 }
 0x13f   :  { %481 = vsyncpa [#allocation3 + $0x1], 1 }
 0x140   :  { %482 = vsyncpa [#allocation5], 1 }
 0x141   :  { %484 = vsyncpa [#allocation5 + $0x1], 1 }

</bundles_post_ra>
